<compile_context>
chip_gen: v7x
topology: tpu7x:2x2x1
jax: 0.10.0
libtpu: 0.0.40
codegen_flags: <defaults>
</compile_context>

<pallas_src>
import functools

import jax
import jax.numpy as jnp
from jax import lax
from jax.experimental import pallas as pl
from jax.experimental.pallas import tpu as pltpu


def _mean_pool_kernel(hidden_ref, mask_ref, out_ref, acc_ref, msum_ref, *,
                      eps, seq_len, seq_tile, mask_tail):
    # hidden_ref: (tb, ts, H), mask_ref: (tb, ts), out_ref: (tb, H)
    # acc_ref: (tb, H) f32, msum_ref: (tb, 1) f32
    s = pl.program_id(1)

    @pl.when(s == 0)
    def _init():
        acc_ref[...] = jnp.zeros_like(acc_ref)
        msum_ref[...] = jnp.zeros_like(msum_ref)

    h = hidden_ref[...]                              # native dtype (bf16/f32)
    m = mask_ref[...]                                # (tb, ts)

    if mask_tail:
        # Last sequence tile extends past S: zero both mask and hidden in the
        # out-of-range region via `where` (inert to NaN/garbage block fill).
        pos = s * seq_tile + lax.broadcasted_iota(jnp.int32, m.shape, 1)
        valid = pos < seq_len
        m = jnp.where(valid, m, jnp.zeros((), m.dtype))
        h = jnp.where(valid[:, :, None], h, jnp.zeros((), h.dtype))

    # Multiply in the hidden dtype (exact for 0/1 masks), accumulate in f32.
    prod = h * m.astype(h.dtype)[:, :, None]                        # (tb, ts, H)
    acc_ref[...] += jnp.sum(prod, axis=1, dtype=jnp.float32)        # (tb, H)
    msum_ref[...] += jnp.sum(m.astype(jnp.float32), axis=1, keepdims=True)

    @pl.when(s == pl.num_programs(1) - 1)
    def _finalize():
        denom = jnp.maximum(msum_ref[...], eps)      # torch.clamp(min=1e-9)
        out_ref[...] = (acc_ref[...] / denom).astype(out_ref.dtype)


def _vmem_capacity_bytes():
    try:
        return int(pltpu.get_tpu_info().vmem_capacity_bytes)
    except Exception:
        return 64 << 20          # conservative fallback: v7x per-TensorCore VMEM


def _derive_tiles(B, S, H, hid_isz, mask_isz, budget_bytes):
    """Pick (tb, ts) so double-buffered blocks + f32 temps fit the budget."""
    # Per (batch-row, seq-pos) cell: 2x native hidden + 1x f32 intermediate,
    # plus the (small) mask contribution.
    cell_bytes = H * (2 * hid_isz + 4) + (2 * mask_isz + 4)
    max_cells = max(1, int(budget_bytes * 0.8) // cell_bytes)

    def batch_tile(cap):
        if cap >= B:
            return B                            # full batch dim: always legal
        return max(8, (cap // 8) * 8)           # mult. of 8; partial last tile OK

    min_ts = S if S <= 128 else 128             # mask block lane constraint
    tb = batch_tile(min(128, max(1, max_cells // min_ts)))

    ts_cap = max(1, max_cells // tb)
    if ts_cap >= S:
        ts = S
    elif S > 128 and ts_cap >= 128:
        ts = (ts_cap // 128) * 128              # lane-aligned sequence tile
    else:
        ts = min_ts                             # smallest legal sequence tile
        tb = batch_tile(max(1, max_cells // ts))
    return tb, ts


def mean_pooling(last_hidden_state, attention_mask, *, eps=1e-9):
    """last_hidden_state: (B, S, H); attention_mask: (B, S). Returns (B, H)."""
    B, S, H = last_hidden_state.shape
    assert attention_mask.shape == (B, S)

    hid_isz = jnp.dtype(last_hidden_state.dtype).itemsize
    mask_isz = jnp.dtype(attention_mask.dtype).itemsize

    vmem_cap = _vmem_capacity_bytes()
    budget = int(vmem_cap * 0.65)               # ~41 MiB on v7x, ~83 MiB on v5e/v6e
    tb, ts = _derive_tiles(B, S, H, hid_isz, mask_isz, budget)

    grid = (pl.cdiv(B, tb), pl.cdiv(S, ts))
    mask_tail = (S % ts) != 0

    kernel = functools.partial(
        _mean_pool_kernel, eps=eps, seq_len=S, seq_tile=ts, mask_tail=mask_tail)

    # Honest VMEM accounting for the compiler limit (double-buffered blocks,
    # f32 intermediates, accumulators) + headroom, capped at physical VMEM.
    needed = (2 * tb * ts * H * hid_isz         # hidden blocks (double-buffered)
              + 2 * tb * ts * mask_isz          # mask blocks
              + 2 * tb * H * hid_isz            # output blocks
              + tb * ts * H * 4                 # f32 intermediates
              + tb * H * 4 + tb * 128 * 4)      # accumulator scratch
    vmem_limit = int(min(vmem_cap, max(int(needed * 1.25), 16 << 20)))

    return pl.pallas_call(
        kernel,
        out_shape=jax.ShapeDtypeStruct((B, H), last_hidden_state.dtype),
        grid_spec=pltpu.PrefetchScalarGridSpec(
            num_scalar_prefetch=0,
            grid=grid,
            in_specs=[
                pl.BlockSpec((tb, ts, H), lambda i, s: (i, s, 0)),
                pl.BlockSpec((tb, ts), lambda i, s: (i, s)),
            ],
            out_specs=pl.BlockSpec((tb, H), lambda i, s: (i, 0)),
            scratch_shapes=[
                pltpu.VMEM((tb, H), jnp.float32),   # masked-sum accumulator
                pltpu.VMEM((tb, 1), jnp.float32),   # mask-count accumulator
            ],
        ),
        compiler_params=pltpu.CompilerParams(
            dimension_semantics=("parallel", "arbitrary"),
            vmem_limit_bytes=vmem_limit),
    )(last_hidden_state, attention_mask)


def _reference(last_hidden_state, attention_mask, eps=1e-9):
    h = last_hidden_state.astype(jnp.float32)
    m = attention_mask.astype(jnp.float32)[:, :, None]
    sum_emb = jnp.sum(h * m, axis=1)
    sum_mask = jnp.maximum(jnp.sum(m, axis=1), eps)
    return (sum_emb / sum_mask).astype(last_hidden_state.dtype)


if __name__ == "__main__":
    key = jax.random.PRNGKey(0)
    k1, k2 = jax.random.split(key)

    B, S, H = 2, 8, 32
    last_hidden = jax.random.normal(k1, (B, S, H), dtype=jnp.float32)
    # deterministic ragged attention mask (first rows valid, tail padded out)
    lengths = jax.random.randint(k2, (B,), 1, S + 1)
    attention_mask = (jnp.arange(S)[None, :] < lengths[:, None]).astype(jnp.float32)

    out = jax.block_until_ready(mean_pooling(last_hidden, attention_mask))
    ref = _reference(last_hidden, attention_mask)

    assert out.shape == (B, H), out.shape
    assert jnp.allclose(out, ref, rtol=1e-5, atol=1e-5), (out, ref)

    print("KERNEL_OK")
</pallas_src>

<mosaic_0001>
module attributes {stable_mosaic.version = 11 : i64} {
  func.func @_mean_pool_kernel(%arg0: i32, %arg1: i32, %arg2: memref<2x8x32xf32, #tpu.memory_space<vmem>>, %arg3: memref<2x8xf32, #tpu.memory_space<vmem>>, %arg4: memref<2x32xf32, #tpu.memory_space<vmem>>, %arg5: memref<2x32xf32, #tpu.memory_space<vmem>>, %arg6: memref<2x1xf32, #tpu.memory_space<vmem>>) attributes {dimension_semantics = [#tpu.dimension_semantics<parallel>, #tpu.dimension_semantics<arbitrary>], iteration_bounds = array<i64: 1, 1>, scalar_prefetch = 0 : i64, scratch_operands = 2 : i64, tpu.core_type = #tpu.core_type<tc>, window_params = [{transform_indices = @transform_0, window_bounds = array<i64: 2, 8, 32>}, {transform_indices = @transform_1, window_bounds = array<i64: 2, 8>}, {transform_indices = @transform_2, window_bounds = array<i64: 2, 32>}]} {
    %c0_i32 = arith.constant 0 : i32
    %0 = arith.cmpi eq, %arg1, %c0_i32 : i32
    %1 = arith.extui %0 : i1 to i32
    %c0_i32_0 = arith.constant 0 : i32
    %2 = arith.cmpi ne, %1, %c0_i32_0 : i32
    scf.if %2 {
      %cst_16 = arith.constant 0.000000e+00 : f32
      %20 = vector.broadcast %cst_16 : f32 to vector<2x32xf32>
      %c0_17 = arith.constant 0 : index
      %c0_18 = arith.constant 0 : index
      %21 = vector.load %arg5[%c0_17, %c0_18] : memref<2x32xf32, #tpu.memory_space<vmem>>, vector<2x32xf32>
      tpu.vector_store %arg5[%c0_17, %c0_18], %20 {strides = array<i32>} : memref<2x32xf32, #tpu.memory_space<vmem>>, vector<2x32xf32>,
      %cst_19 = arith.constant 0.000000e+00 : f32
      %22 = vector.broadcast %cst_19 : f32 to vector<2x1xf32>
      %c0_20 = arith.constant 0 : index
      %c0_21 = arith.constant 0 : index
      %23 = vector.load %arg6[%c0_20, %c0_21] : memref<2x1xf32, #tpu.memory_space<vmem>>, vector<2x1xf32>
      tpu.vector_store %arg6[%c0_20, %c0_21], %22 {strides = array<i32>} : memref<2x1xf32, #tpu.memory_space<vmem>>, vector<2x1xf32>,
    } else {
    }
    %c0 = arith.constant 0 : index
    %c0_1 = arith.constant 0 : index
    %c0_2 = arith.constant 0 : index
    %3 = vector.load %arg2[%c0, %c0_1, %c0_2] : memref<2x8x32xf32, #tpu.memory_space<vmem>>, vector<2x8x32xf32>
    %c0_3 = arith.constant 0 : index
    %c0_4 = arith.constant 0 : index
    %4 = vector.load %arg3[%c0_3, %c0_4] : memref<2x8xf32, #tpu.memory_space<vmem>>, vector<2x8xf32>
    %5 = vector.shape_cast %4 : vector<2x8xf32> to vector<2x8x1xf32>
    %6 = vector.broadcast %5 : vector<2x8x1xf32> to vector<2x8x32xf32>
    %7 = arith.mulf %3, %6 : vector<2x8x32xf32>
    %c0_5 = arith.constant 0 : index
    %c0_6 = arith.constant 0 : index
    %8 = vector.load %arg5[%c0_5, %c0_6] : memref<2x32xf32, #tpu.memory_space<vmem>>, vector<2x32xf32>
    %cst = arith.constant dense<0.000000e+00> : vector<2x32xf32>
    %9 = vector.multi_reduction <add>, %7, %cst [1] : vector<2x8x32xf32> to vector<2x32xf32>
    %10 = arith.addf %8, %9 : vector<2x32xf32>
    %c0_7 = arith.constant 0 : index
    %c0_8 = arith.constant 0 : index
    %11 = vector.load %arg5[%c0_7, %c0_8] : memref<2x32xf32, #tpu.memory_space<vmem>>, vector<2x32xf32>
    tpu.vector_store %arg5[%c0_7, %c0_8], %10 {strides = array<i32>} : memref<2x32xf32, #tpu.memory_space<vmem>>, vector<2x32xf32>,
    %c0_9 = arith.constant 0 : index
    %c0_10 = arith.constant 0 : index
    %12 = vector.load %arg6[%c0_9, %c0_10] : memref<2x1xf32, #tpu.memory_space<vmem>>, vector<2x1xf32>
    %cst_11 = arith.constant dense<0.000000e+00> : vector<2xf32>
    %13 = vector.multi_reduction <add>, %4, %cst_11 [1] : vector<2x8xf32> to vector<2xf32>
    %14 = vector.shape_cast %13 : vector<2xf32> to vector<2x1xf32>
    %15 = arith.addf %12, %14 : vector<2x1xf32>
    %c0_12 = arith.constant 0 : index
    %c0_13 = arith.constant 0 : index
    %16 = vector.load %arg6[%c0_12, %c0_13] : memref<2x1xf32, #tpu.memory_space<vmem>>, vector<2x1xf32>
    tpu.vector_store %arg6[%c0_12, %c0_13], %15 {strides = array<i32>} : memref<2x1xf32, #tpu.memory_space<vmem>>, vector<2x1xf32>,
    %c0_i32_14 = arith.constant 0 : i32
    %17 = arith.cmpi eq, %arg1, %c0_i32_14 : i32
    %18 = arith.extui %17 : i1 to i32
    %c0_i32_15 = arith.constant 0 : i32
    %19 = arith.cmpi ne, %18, %c0_i32_15 : i32
    scf.if %19 {
      %c0_16 = arith.constant 0 : index
      %c0_17 = arith.constant 0 : index
      %20 = vector.load %arg6[%c0_16, %c0_17] : memref<2x1xf32, #tpu.memory_space<vmem>>, vector<2x1xf32>
      %cst_18 = arith.constant 9.99999971E-10 : f32
      %21 = vector.broadcast %cst_18 : f32 to vector<2x1xf32>
      %22 = arith.maximumf %20, %21 : vector<2x1xf32>
      %c0_19 = arith.constant 0 : index
      %c0_20 = arith.constant 0 : index
      %23 = vector.load %arg5[%c0_19, %c0_20] : memref<2x32xf32, #tpu.memory_space<vmem>>, vector<2x32xf32>
      %24 = vector.broadcast %22 : vector<2x1xf32> to vector<2x32xf32>
      %25 = arith.divf %23, %24 : vector<2x32xf32>
      %c0_21 = arith.constant 0 : index
      %c0_22 = arith.constant 0 : index
      %26 = vector.load %arg4[%c0_21, %c0_22] : memref<2x32xf32, #tpu.memory_space<vmem>>, vector<2x32xf32>
      tpu.vector_store %arg4[%c0_21, %c0_22], %25 {strides = array<i32>} : memref<2x32xf32, #tpu.memory_space<vmem>>, vector<2x32xf32>,
    } else {
    }
    return
  }
  func.func @transform_0(%arg0: i32, %arg1: i32) -> (i32, i32, i32) {
    %c0_i32 = arith.constant 0 : i32
    %c0_i32_0 = arith.constant 0 : i32
    return %arg0, %arg1, %c0_i32 : i32, i32, i32
  }
  func.func @transform_1(%arg0: i32, %arg1: i32) -> (i32, i32) {
    %c0_i32 = arith.constant 0 : i32
    return %arg0, %arg1 : i32, i32
  }
  func.func @transform_2(%arg0: i32, %arg1: i32) -> (i32, i32) {
    %c0_i32 = arith.constant 0 : i32
    %c0_i32_0 = arith.constant 0 : i32
    return %arg0, %c0_i32 : i32, i32
  }
}

</mosaic_0001>

<bundles_post_ra>
// kernel: tpu_custom_call.1
= control target key start
LH: loop header
LB: loop body
LE: loop exit
PB: predicated region body
PF: predicated region fallthrough
CT: control target
= control target key end

     0   :  { %7 = vsyncpa [#allocation5], 0  ;;  %s225_s0 = inlined_call_operand.hbm [shape: f32[2,8,32], index: 0, kind: input, shape index: {}]   ;;  %s226_s1 = inlined_call_operand.vmem [shape: f32[2,8], index: 1, kind: input, shape index: {}]   ;;  %s227_s2 = inlined_call_operand.hbm [shape: f32[2,32], index: 2, kind: output, shape index: {}]  }
   0x1   :  { %8 = vsyncpa [#allocation6], 0  ;;  %s172_s9 = smov [#allocation4]   ;;  %s124_s13 = scalar_lea.hbm %s225_s0, 256 }
   0x2   :  { %s14_s10 = sshll.u32 %s172_s9, 4  ;;  %p125_p0 = scmp.ne.s32.totalorder %s225_s0, %s124_s13  ;;  %s15_s10 = int_to_ptr.vmem [resolvable:$true] %s14_s10 }
   0x3   :  { %p128_p1 = scmp.lt.u32.totalorder %s124_s13, %s225_s0 }
   0x5   :  { %p130_p2 = pnand %p128_p1, %p125_p0 }
   0x7   :  { %133 = shalt.err (!%p130_p2)
}
   0x8   :  { %s134_s18 = scalar_lea.vmem %s15_s10, 256  ;;  %p139_p4 = scmp.lt.s32.totalorder %s15_s10, %s15_s10 }
   0x9   :  { %p135_p3 = scmp.ne.s32.totalorder %s15_s10, %s134_s18  ;;  %p140_p5 = scmp.lt.s32.totalorder %s134_s18, %s134_s18 }
   0xb   :  { %p141_p6 = por %p140_p5, %p139_p4 }
   0xd   :  { %p142_p7 = pnand %p141_p6, %p135_p3 }
   0xf   :  { %145 = shalt.err (!%p142_p7)
}
  0x10   :  { %s173_s19 = smov 128   ;;  %s174_s20 = smov 8  }
  0x11   :  { %20 = dma.hbm_to_vmem [thread:$0]  %s225_s0, 256, %s15_s10, [#allocation5], %s173_s19, %s173_s19, %s174_s20  }
  0x12   :  { %168 = dma.done.wait [#allocation5], 256  }
  0x13   :  { %169 = vsyncadd [#allocation5], 4294967040  ;;  %vm32_vm0 = vcmask 1024   ;;  %v175_v0 = vmov 0.0   ;;  %vm78_vm1 = vcmask 58368   ;;  %v37_v3 = vlaneseq  ;;  %v35_v10 = vld [vmem:[#allocation4 + $0x8] sm:$0xff] }
  0x14   :  { %33 = vst.msk [vmem:[#allocation3] sm:$0x3] %vm32_vm0, %v175_v0  ;;  %v36_v1 = vld [vmem:[%s226_s1] sm:$0x3]  ;;  %v176_v8 = vmov 0   ;;  %vm54_vm2 = vcmask 261120  }
  0x15   :  { %v79_v2 = vsel %vm78_vm1, %v36_v1, 0.0  ;;  %v38_v4 = vshrl.u32 %v37_v3, 7  ;;  %120 = vset.pattern.permute.xlu1 %v176_v8  ;;  %121 = vset.pattern.permute.xlu0 %v176_v8  ;;  %vm30_vm3 = vcmask 254976   ;;  %v34_v19 = vld [vmem:[#allocation4] sm:$0xff]  ;;  %vm71_vm4 = vcmask 1041409   ;;  %s177_s0 = smov [#allocation7]  }
  0x16   :  { %80 = vadd.xlane.f32.xlu0 %v79_v2  ;;  %31 = vst.msk [vmem:[#allocation2] sm:$0x3] %vm30_vm3, %v175_v0  ;;  %s105_s1 = sshll.u32 %s177_s0, 4  ;;  %s106_s1 = int_to_ptr.vmem [resolvable:$true] %s105_s1 }
  0x17   :  { %v46_v5 = vsub.s32 1, %v38_v4  ;;  %v39_v7 = vsub.s32 0, %v38_v4  ;;  %s146_s25 = scalar_lea.vmem %s106_s1, 32  ;;  %p151_p9 = scmp.lt.s32.totalorder %s106_s1, %s106_s1 }
  0x18   :  { %p147_p8 = scmp.ne.s32.totalorder %s106_s1, %s146_s25  ;;  %p152_p10 = scmp.lt.s32.totalorder %s146_s25, %s146_s25 }
  0x19   :  { %v47_v6 = vrot.slane %v36_v1, %v46_v5  ;;  %v40_v9 = vrot.slane %v36_v1, %v39_v7 }
  0x1a   :  { %p153_p11 = por %p152_p10, %p151_p9 }
  0x1b   :  { %49 = vbcast.lane.b32.xlu1 %v47_v6, 256  ;;  %v77_v15 = vld [vmem:[#allocation3] sm:$0x3] }
  0x1c   :  { %p154_p12 = pnand %p153_p11, %p147_p8 }
  0x1d   :  { %v53_v35 = vld [vmem:[#allocation2] sm:$0x3] }
  0x2c   :  { %42 = vbcast.lane.b32.xlu0 %v40_v9, 256 }
  0x8d   :  { %v50_v11 = vpop.permute.xlu1 %49 }
  0x8e   :  { %v52_v12 = vmul.f32 %v50_v11, %v35_v10 }
  0x90   :  { %v62_v13 = vsel %vm54_vm2, %v52_v12, 0.0 }
  0x91   :  { %v63_v14 = vrot.slane %v62_v13, 4 }
  0x93   :  { %v64_v17 = vadd.f32 %v63_v14, %v62_v13 }
  0x95   :  { %v65_v20 = vrot.slane %v64_v17, 2 }
  0x97   :  { %v66_v24 = vadd.f32 %v65_v20, %v64_v17 }
  0x99   :  { %v67_v29 = vrot.slane %v66_v24, 1 }
  0x9b   :  { %v68_v32 = vadd.f32 %v67_v29, %v66_v24 }
  0xa3   :  { %v81_v16 = vpop.xlane.xlu0 %80 }
  0xa4   :  { %v82_v18 = vadd.f32 %v81_v16, %v77_v15 }
  0xa6   :  { %84 = vst.msk [vmem:[#allocation3] sm:$0x3] %vm32_vm0, %v82_v18 }
  0xa7   :  { %v43_v21 = vpop.permute.xlu0 %42 }
  0xa8   :  { %v51_v22 = vmul.f32 %v43_v21, %v34_v19 }
  0xaa   :  { %v55_v23 = vsel %vm54_vm2, %v51_v22, 0.0 }
  0xab   :  { %v56_v25 = vrot.slane %v55_v23, 4 }
  0xad   :  { %v88_v26 = vld [vmem:[#allocation3] sm:$0x3]  ;;  %v57_v27 = vadd.f32 %v56_v25, %v55_v23 }
  0xae   :  { %v89_v28 = vmax.f32 %v88_v26, 1e-09 }
  0xaf   :  { %v58_v30 = vrot.slane %v57_v27, 2 }
  0xb0   :  { %93 = vperm.xlu1 %120, %v89_v28  }
  0xb1   :  { %v59_v31 = vadd.f32 %v58_v30, %v57_v27 }
  0xb3   :  { %v60_v33 = vrot.slane %v59_v31, 1 }
  0xb5   :  { %v61_v34 = vadd.f32 %v60_v33, %v59_v31 }
  0xb7   :  { %v72_v36 = vsel %vm71_vm4, %v68_v32, %v61_v34 }
  0xb8   :  { %v74_v37 = vadd.f32 %v72_v36, %v53_v35 }
  0xba   :  { %76 = vst.msk [vmem:[#allocation2] sm:$0x3] %vm30_vm3, %v74_v37 }
  0xc1   :  { %v90_v40 = vld [vmem:[#allocation2] sm:$0x3] }
 0x12f   :  { %v94_v38 = vpop.permute.xlu1 %93 }
 0x130   :  { %122 = vrcp.f32 %v94_v38 }
 0x13a   :  { %v123_v39 = vpop.eup %122 }
 0x13b   :  { %v97_v41 = vmul.f32 %v123_v39, %v90_v40 }
 0x13d   :  { %98 = vst.msk [vmem:[#allocation7] sm:$0x3] %vm30_vm3, %v97_v41 }
 0x13e   :  { %157 = shalt.err (!%p154_p12)
}
 0x13f   :  { %s158_s28 = scalar_lea.hbm %s227_s2, 32 }
 0x140   :  { %p159_p13 = scmp.ne.s32.totalorder %s227_s2, %s158_s28  ;;  %p162_p0 = scmp.lt.u32.totalorder %s158_s28, %s227_s2 }
 0x142   :  { %p164_p1 = pnand %p162_p0, %p159_p13 }
 0x144   :  { %167 = shalt.err (!%p164_p1)
}
 0x145   :  { %108 = dma.vmem_to_hbm [thread:$0]  %s106_s1, 32, %s227_s2, [#allocation6]  }
 0x146   :  { %170 = dma.done.wait [#allocation6], 32  }
 0x147   :  { %171 = vsyncadd [#allocation6], 4294967264 }
 0x148   :  { %112 = vsyncpa [#allocation5], 1 }
 0x149   :  { %113 = vsyncpa [#allocation6], 1 }

</bundles_post_ra>
